<compile_context>
chip_gen: v7x
topology: tpu7x:2x2x1
jax: 0.10.0
libtpu: 0.0.40
codegen_flags: <defaults>
</compile_context>

<pallas_src>
import functools

import jax
import jax.numpy as jnp
from jax import lax
from jax.experimental import pallas as pl
from jax.experimental.pallas import tpu as pltpu


def _round_up(v, m):
    return ((v + m - 1) // m) * m


def _encoder_gt_kernel(adj_ref, x_ref, w_ref, b_ref, o_ref, x_sc, *, n_layers):
    """All Encoder_GT layers for one batch element, fully VMEM-resident.

    adj_ref: (1, Np, Np) bf16     x_ref: (1, Np, Dp) bf16
    w_ref:   (L, Dp, Dp) bf16     b_ref: (L, 1, Dp)  f32
    o_ref:   (1, Np, Dp) f32      x_sc:  (Np, Dp)    bf16 VMEM scratch
    """
    adj = adj_ref[0]                        # (Np, Np) bf16, reused every layer
    x_sc[...] = x_ref[0]                    # seed the layer-carry scratch

    def hidden_layer(i, carry):
        # message passing: neighbor aggregation (MXU, f32 accumulate)
        h = jnp.dot(adj, x_sc[...], preferred_element_type=jnp.float32)
        # feature projection + bias + ReLU (bias loaded from VMEM-resident stack)
        y = jnp.dot(h.astype(jnp.bfloat16), w_ref[i],
                    preferred_element_type=jnp.float32)
        y = jnp.maximum(y + b_ref[i], 0.0)
        x_sc[...] = y.astype(x_sc.dtype)
        return carry

    # (n-1) hidden layers; short static trip count -> unrolled for LLO visibility
    lax.fori_loop(0, n_layers - 1, hidden_layer, 0, unroll=True)

    # last layer: no activation, write f32 result lane-dense (Dp = 128 lanes)
    h = jnp.dot(adj, x_sc[...], preferred_element_type=jnp.float32)
    y = jnp.dot(h.astype(jnp.bfloat16), w_ref[n_layers - 1],
                preferred_element_type=jnp.float32)
    o_ref[0] = (y + b_ref[n_layers - 1]).astype(o_ref.dtype)


def encoder_gt_forward(x, adj, hid_params, last_params):
    """Encoder_GT.forward: (n-1) hidden layers + last layer, fused in one kernel."""
    B, N, D = x.shape
    L = len(hid_params) + 1
    Dp = _round_up(D, 128)            # lane-dense feature axis (pad to 128 lanes)
    Np = _round_up(N, 16)             # bf16 sublane-aligned node axis

    # Stack & zero-pad all layer weights / biases once on the host side.
    ws = [w for (w, _) in hid_params] + [last_params[0]]
    bs = [b for (_, b) in hid_params] + [last_params[1]]
    w_all = (jnp.zeros((L, Dp, Dp), jnp.float32)
             .at[:, :D, :D].set(jnp.stack(ws))
             .astype(jnp.bfloat16))                                  # MXU-native
    b_all = jnp.zeros((L, 1, Dp), jnp.float32).at[:, 0, :D].set(jnp.stack(bs))

    # Zero-pad + bf16-cast inputs (halves adj DMA bytes; padding is exact:
    # padded adj rows/cols are zero so padded nodes never contaminate real ones).
    x_p = (jnp.zeros((B, Np, Dp), jnp.bfloat16)
           .at[:, :N, :D].set(x.astype(jnp.bfloat16)))
    adj_p = (jnp.zeros((B, Np, Np), jnp.bfloat16)
             .at[:, :N, :N].set(adj.astype(jnp.bfloat16)))

    kernel = functools.partial(_encoder_gt_kernel, n_layers=L)
    out = pl.pallas_call(
        kernel,
        out_shape=jax.ShapeDtypeStruct((B, Np, Dp), jnp.float32),
        grid_spec=pltpu.PrefetchScalarGridSpec(
            num_scalar_prefetch=0,
            grid=(B,),
            in_specs=[
                pl.BlockSpec((1, Np, Np), lambda i: (i, 0, 0)),   # adj (per batch)
                pl.BlockSpec((1, Np, Dp), lambda i: (i, 0, 0)),   # x   (per batch)
                pl.BlockSpec((L, Dp, Dp), lambda i: (0, 0, 0)),   # all W, fetched once
                pl.BlockSpec((L, 1, Dp), lambda i: (0, 0, 0)),    # all b, fetched once
            ],
            out_specs=pl.BlockSpec((1, Np, Dp), lambda i: (i, 0, 0)),
            scratch_shapes=[pltpu.VMEM((Np, Dp), jnp.bfloat16)],  # layer carry
        ),
        compiler_params=pltpu.CompilerParams(
            dimension_semantics=("parallel",),
        ),
    )(adj_p, x_p, w_all, b_all)
    # TODO(synk): for very large N (v7x 64 MiB VMEM) add node-dim tiling with a
    # reduction grid axis + f32 accumulator; unnecessary at these shapes.
    return out[:, :N, :D]


def encoder_gt_reference(x, adj, hid_params, last_params):
    """Pure-JAX reference using the same bf16-matmul / f32-accumulate numerics."""
    adj_bf = adj.astype(jnp.bfloat16)

    def one_layer(xb, w, b, relu):
        h = jnp.einsum("bij,bjd->bid", adj_bf, xb,
                       preferred_element_type=jnp.float32)
        y = jnp.einsum("bnd,de->bne", h.astype(jnp.bfloat16),
                       w.astype(jnp.bfloat16),
                       preferred_element_type=jnp.float32) + b
        return jnp.maximum(y, 0.0) if relu else y

    xb = x.astype(jnp.bfloat16)
    for (w, b) in hid_params:
        xb = one_layer(xb, w, b, relu=True).astype(jnp.bfloat16)
    w_last, b_last = last_params
    return one_layer(xb, w_last, b_last, relu=False)


if __name__ == "__main__":
    key = jax.random.PRNGKey(0)
    B, N, D = 2, 8, 32            # batch, nodes, hidden
    n_layers = 3                  # 2 hidden layers (deep-copied weights) + last

    k_x, k_adj, k_w, k_b, k_wl, k_bl = jax.random.split(key, 6)

    x = jax.random.normal(k_x, (B, N, D), dtype=jnp.float32)
    adj_raw = jax.random.uniform(k_adj, (B, N, N), dtype=jnp.float32)
    adj = (adj_raw > 0.5).astype(jnp.float32)
    # symmetrize + self loops, row-normalize (typical GT preprocessing)
    adj = jnp.minimum(adj + jnp.transpose(adj, (0, 2, 1)) + jnp.eye(N)[None], 1.0)
    adj = adj / jnp.sum(adj, axis=-1, keepdims=True)

    # deepcopy(hid_layer) at __init__ => identical weights for all hidden layers
    w_hid = jax.random.normal(k_w, (D, D), dtype=jnp.float32) * (1.0 / jnp.sqrt(D))
    b_hid = jax.random.normal(k_b, (D,), dtype=jnp.float32) * 0.01
    w_last = jax.random.normal(k_wl, (D, D), dtype=jnp.float32) * (1.0 / jnp.sqrt(D))
    b_last = jax.random.normal(k_bl, (D,), dtype=jnp.float32) * 0.01

    hid_params = [(w_hid, b_hid) for _ in range(n_layers - 1)]
    last_params = (w_last, b_last)

    out = jax.block_until_ready(encoder_gt_forward(x, adj, hid_params, last_params))
    ref = encoder_gt_reference(x, adj, hid_params, last_params)

    assert out.shape == (B, N, D)
    assert jnp.allclose(out, ref, atol=2e-2, rtol=2e-2), "mismatch vs reference"

    print("KERNEL_OK")
</pallas_src>

<mosaic_0001>
module attributes {stable_mosaic.version = 11 : i64} {
  func.func @_encoder_gt_kernel(%arg0: i32, %arg1: memref<1x16x16xbf16, #tpu.memory_space<vmem>>, %arg2: memref<1x16x128xbf16, #tpu.memory_space<vmem>>, %arg3: memref<3x128x128xbf16, #tpu.memory_space<vmem>>, %arg4: memref<3x1x128xf32, #tpu.memory_space<vmem>>, %arg5: memref<1x16x128xf32, #tpu.memory_space<vmem>>, %arg6: memref<16x128xbf16, #tpu.memory_space<vmem>>) attributes {dimension_semantics = [#tpu.dimension_semantics<parallel>], iteration_bounds = array<i64: 2>, scalar_prefetch = 0 : i64, scratch_operands = 1 : i64, tpu.core_type = #tpu.core_type<tc>, window_params = [{transform_indices = @transform_0, window_bounds = array<i64: 1, 16, 16>}, {transform_indices = @transform_1, window_bounds = array<i64: 1, 16, 128>}, {pipeline_mode = #tpu.pipeline_mode<synchronous>, transform_indices = @transform_2, window_bounds = array<i64: 3, 128, 128>}, {pipeline_mode = #tpu.pipeline_mode<synchronous>, transform_indices = @transform_3, window_bounds = array<i64: 3, 1, 128>}, {transform_indices = @transform_4, window_bounds = array<i64: 1, 16, 128>}]} {
    %c0 = arith.constant 0 : index
    %c0_0 = arith.constant 0 : index
    %c0_1 = arith.constant 0 : index
    %0 = vector.load %arg1[%c0, %c0_0, %c0_1] : memref<1x16x16xbf16, #tpu.memory_space<vmem>>, vector<1x16x16xbf16>
    %1 = vector.shape_cast %0 : vector<1x16x16xbf16> to vector<16x16xbf16>
    %c0_2 = arith.constant 0 : index
    %c0_3 = arith.constant 0 : index
    %c0_4 = arith.constant 0 : index
    %2 = vector.load %arg2[%c0_2, %c0_3, %c0_4] : memref<1x16x128xbf16, #tpu.memory_space<vmem>>, vector<1x16x128xbf16>
    %3 = vector.shape_cast %2 : vector<1x16x128xbf16> to vector<16x128xbf16>
    %c0_5 = arith.constant 0 : index
    %c0_6 = arith.constant 0 : index
    %4 = vector.load %arg6[%c0_5, %c0_6] : memref<16x128xbf16, #tpu.memory_space<vmem>>, vector<16x128xbf16>
    tpu.vector_store %arg6[%c0_5, %c0_6], %3 {strides = array<i32>} : memref<16x128xbf16, #tpu.memory_space<vmem>>, vector<16x128xbf16>,
    %c0_i32 = arith.constant 0 : i32
    %c0_7 = arith.constant 0 : index
    %c0_8 = arith.constant 0 : index
    %5 = vector.load %arg6[%c0_7, %c0_8] : memref<16x128xbf16, #tpu.memory_space<vmem>>, vector<16x128xbf16>
    %cst = arith.constant dense<0.000000e+00> : vector<16x128xf32>
    %6 = tpu.matmul %1, %5, %cst {dimension_numbers = #tpu.dot_dimension_numbers<[1], [0], [0], [1], [0, 0, 1, 1], [], []>} : vector<16x16xbf16>, vector<16x128xbf16>, vector<16x128xf32> -> vector<16x128xf32>
    %7 = arith.truncf %6 : vector<16x128xf32> to vector<16x128xbf16>
    %8 = arith.index_cast %c0_i32 : i32 to index
    %c0_9 = arith.constant 0 : index
    %c0_10 = arith.constant 0 : index
    %9 = vector.load %arg3[%8, %c0_9, %c0_10] : memref<3x128x128xbf16, #tpu.memory_space<vmem>>, vector<1x128x128xbf16>
    %10 = vector.shape_cast %9 : vector<1x128x128xbf16> to vector<128x128xbf16>
    %cst_11 = arith.constant dense<0.000000e+00> : vector<16x128xf32>
    %11 = tpu.matmul %7, %10, %cst_11 {dimension_numbers = #tpu.dot_dimension_numbers<[1], [0], [0], [1], [0, 0, 1, 1], [], []>} : vector<16x128xbf16>, vector<128x128xbf16>, vector<16x128xf32> -> vector<16x128xf32>
    %12 = arith.index_cast %c0_i32 : i32 to index
    %c0_12 = arith.constant 0 : index
    %c0_13 = arith.constant 0 : index
    %13 = vector.load %arg4[%12, %c0_12, %c0_13] : memref<3x1x128xf32, #tpu.memory_space<vmem>>, vector<1x1x128xf32>
    %14 = vector.shape_cast %13 : vector<1x1x128xf32> to vector<1x128xf32>
    %15 = vector.broadcast %14 : vector<1x128xf32> to vector<16x128xf32>
    %16 = arith.addf %11, %15 : vector<16x128xf32>
    %cst_14 = arith.constant 0.000000e+00 : f32
    %17 = vector.broadcast %cst_14 : f32 to vector<16x128xf32>
    %18 = arith.maximumf %16, %17 : vector<16x128xf32>
    %19 = arith.truncf %18 : vector<16x128xf32> to vector<16x128xbf16>
    %c0_15 = arith.constant 0 : index
    %c0_16 = arith.constant 0 : index
    %20 = vector.load %arg6[%c0_15, %c0_16] : memref<16x128xbf16, #tpu.memory_space<vmem>>, vector<16x128xbf16>
    tpu.vector_store %arg6[%c0_15, %c0_16], %19 {strides = array<i32>} : memref<16x128xbf16, #tpu.memory_space<vmem>>, vector<16x128xbf16>,
    %c1_i32 = arith.constant 1 : i32
    %c0_17 = arith.constant 0 : index
    %c0_18 = arith.constant 0 : index
    %21 = vector.load %arg6[%c0_17, %c0_18] : memref<16x128xbf16, #tpu.memory_space<vmem>>, vector<16x128xbf16>
    %cst_19 = arith.constant dense<0.000000e+00> : vector<16x128xf32>
    %22 = tpu.matmul %1, %21, %cst_19 {dimension_numbers = #tpu.dot_dimension_numbers<[1], [0], [0], [1], [0, 0, 1, 1], [], []>} : vector<16x16xbf16>, vector<16x128xbf16>, vector<16x128xf32> -> vector<16x128xf32>
    %23 = arith.truncf %22 : vector<16x128xf32> to vector<16x128xbf16>
    %24 = arith.index_cast %c1_i32 : i32 to index
    %c0_20 = arith.constant 0 : index
    %c0_21 = arith.constant 0 : index
    %25 = vector.load %arg3[%24, %c0_20, %c0_21] : memref<3x128x128xbf16, #tpu.memory_space<vmem>>, vector<1x128x128xbf16>
    %26 = vector.shape_cast %25 : vector<1x128x128xbf16> to vector<128x128xbf16>
    %cst_22 = arith.constant dense<0.000000e+00> : vector<16x128xf32>
    %27 = tpu.matmul %23, %26, %cst_22 {dimension_numbers = #tpu.dot_dimension_numbers<[1], [0], [0], [1], [0, 0, 1, 1], [], []>} : vector<16x128xbf16>, vector<128x128xbf16>, vector<16x128xf32> -> vector<16x128xf32>
    %28 = arith.index_cast %c1_i32 : i32 to index
    %c0_23 = arith.constant 0 : index
    %c0_24 = arith.constant 0 : index
    %29 = vector.load %arg4[%28, %c0_23, %c0_24] : memref<3x1x128xf32, #tpu.memory_space<vmem>>, vector<1x1x128xf32>
    %30 = vector.shape_cast %29 : vector<1x1x128xf32> to vector<1x128xf32>
    %31 = vector.broadcast %30 : vector<1x128xf32> to vector<16x128xf32>
    %32 = arith.addf %27, %31 : vector<16x128xf32>
    %cst_25 = arith.constant 0.000000e+00 : f32
    %33 = vector.broadcast %cst_25 : f32 to vector<16x128xf32>
    %34 = arith.maximumf %32, %33 : vector<16x128xf32>
    %35 = arith.truncf %34 : vector<16x128xf32> to vector<16x128xbf16>
    %c0_26 = arith.constant 0 : index
    %c0_27 = arith.constant 0 : index
    %36 = vector.load %arg6[%c0_26, %c0_27] : memref<16x128xbf16, #tpu.memory_space<vmem>>, vector<16x128xbf16>
    tpu.vector_store %arg6[%c0_26, %c0_27], %35 {strides = array<i32>} : memref<16x128xbf16, #tpu.memory_space<vmem>>, vector<16x128xbf16>,
    %c2_i32 = arith.constant 2 : i32
    %c0_28 = arith.constant 0 : index
    %c0_29 = arith.constant 0 : index
    %37 = vector.load %arg6[%c0_28, %c0_29] : memref<16x128xbf16, #tpu.memory_space<vmem>>, vector<16x128xbf16>
    %cst_30 = arith.constant dense<0.000000e+00> : vector<16x128xf32>
    %38 = tpu.matmul %1, %37, %cst_30 {dimension_numbers = #tpu.dot_dimension_numbers<[1], [0], [0], [1], [0, 0, 1, 1], [], []>} : vector<16x16xbf16>, vector<16x128xbf16>, vector<16x128xf32> -> vector<16x128xf32>
    %39 = arith.truncf %38 : vector<16x128xf32> to vector<16x128xbf16>
    %c2 = arith.constant 2 : index
    %c0_31 = arith.constant 0 : index
    %c0_32 = arith.constant 0 : index
    %40 = vector.load %arg3[%c2, %c0_31, %c0_32] : memref<3x128x128xbf16, #tpu.memory_space<vmem>>, vector<1x128x128xbf16>
    %41 = vector.shape_cast %40 : vector<1x128x128xbf16> to vector<128x128xbf16>
    %cst_33 = arith.constant dense<0.000000e+00> : vector<16x128xf32>
    %42 = tpu.matmul %39, %41, %cst_33 {dimension_numbers = #tpu.dot_dimension_numbers<[1], [0], [0], [1], [0, 0, 1, 1], [], []>} : vector<16x128xbf16>, vector<128x128xbf16>, vector<16x128xf32> -> vector<16x128xf32>
    %c2_34 = arith.constant 2 : index
    %c0_35 = arith.constant 0 : index
    %c0_36 = arith.constant 0 : index
    %43 = vector.load %arg4[%c2_34, %c0_35, %c0_36] : memref<3x1x128xf32, #tpu.memory_space<vmem>>, vector<1x1x128xf32>
    %44 = vector.shape_cast %43 : vector<1x1x128xf32> to vector<1x128xf32>
    %45 = vector.broadcast %44 : vector<1x128xf32> to vector<16x128xf32>
    %46 = arith.addf %42, %45 : vector<16x128xf32>
    %c0_37 = arith.constant 0 : index
    %c0_38 = arith.constant 0 : index
    %c0_39 = arith.constant 0 : index
    %47 = vector.load %arg5[%c0_37, %c0_38, %c0_39] : memref<1x16x128xf32, #tpu.memory_space<vmem>>, vector<1x16x128xf32>
    %48 = vector.shape_cast %47 : vector<1x16x128xf32> to vector<16x128xf32>
    %49 = vector.shape_cast %46 : vector<16x128xf32> to vector<1x16x128xf32>
    tpu.vector_store %arg5[%c0_37, %c0_38, %c0_39], %49 {strides = array<i32>} : memref<1x16x128xf32, #tpu.memory_space<vmem>>, vector<1x16x128xf32>,
    return
  }
  func.func @transform_0(%arg0: i32) -> (i32, i32, i32) {
    %c0_i32 = arith.constant 0 : i32
    %c0_i32_0 = arith.constant 0 : i32
    %c0_i32_1 = arith.constant 0 : i32
    return %arg0, %c0_i32, %c0_i32_0 : i32, i32, i32
  }
  func.func @transform_1(%arg0: i32) -> (i32, i32, i32) {
    %c0_i32 = arith.constant 0 : i32
    %c0_i32_0 = arith.constant 0 : i32
    %c0_i32_1 = arith.constant 0 : i32
    return %arg0, %c0_i32, %c0_i32_0 : i32, i32, i32
  }
  func.func @transform_2(%arg0: i32) -> (i32, i32, i32) {
    %c0_i32 = arith.constant 0 : i32
    %c0_i32_0 = arith.constant 0 : i32
    %c0_i32_1 = arith.constant 0 : i32
    %c0_i32_2 = arith.constant 0 : i32
    return %c0_i32, %c0_i32_0, %c0_i32_1 : i32, i32, i32
  }
  func.func @transform_3(%arg0: i32) -> (i32, i32, i32) {
    %c0_i32 = arith.constant 0 : i32
    %c0_i32_0 = arith.constant 0 : i32
    %c0_i32_1 = arith.constant 0 : i32
    %c0_i32_2 = arith.constant 0 : i32
    return %c0_i32, %c0_i32_0, %c0_i32_1 : i32, i32, i32
  }
  func.func @transform_4(%arg0: i32) -> (i32, i32, i32) {
    %c0_i32 = arith.constant 0 : i32
    %c0_i32_0 = arith.constant 0 : i32
    %c0_i32_1 = arith.constant 0 : i32
    return %arg0, %c0_i32, %c0_i32_0 : i32, i32, i32
  }
}

</mosaic_0001>

<bundles_post_ra>
// kernel: tpu_custom_call.1
= control target key start
LH: loop header
LB: loop body
LE: loop exit
PB: predicated region body
PF: predicated region fallthrough
CT: control target
= control target key end

     0   :  { %s1660_s0 = inlined_call_operand.hbm [shape: bf16[2,16,16], index: 0, kind: input, shape index: {}]   ;;  %s1661_s1 = inlined_call_operand.hbm [shape: bf16[2,16,128], index: 1, kind: input, shape index: {}]   ;;  %s1662_s2 = inlined_call_operand.hbm [shape: bf16[3,128,128], index: 2, kind: input, shape index: {}]   ;;  %s1663_s3 = inlined_call_operand.vmem [shape: f32[3,1,128], index: 3, kind: input, shape index: {}]   ;;  %s1664_s4 = inlined_call_operand.hbm [shape: f32[2,16,128], index: 4, kind: output, shape index: {}]  }
   0x1   :  { %1672 = sst [smem:[#allocation15_spill]] %s1660_s0 }
   0x2   :  { %1673 = sst [smem:[#allocation16_spill]] %s1662_s2 }
   0x3   :  { %9 = vsyncpa [#allocation4], 0 }
   0x4   :  { %11 = vsyncpa [#allocation4 + $0x1], 0 }
   0x5   :  { %12 = vsyncpa [#allocation7], 0 }
   0x6   :  { %14 = vsyncpa [#allocation7 + $0x1], 0 }
   0x7   :  { %15 = vsyncpa [#allocation5], 0 }
   0x8   :  { %17 = vsyncpa [#allocation5 + $0x1], 0  ;;  %s1350_s15 = smov 0   ;;  %s1352_s16 = smov 0  }
   0x9   :  { %s1354_s17 = smov 0   ;;  %s1356_s18 = smov 0  }
   0xa LB: > { %s1371_s19 = sadd.s32 4294967295, %s1313_s18   ;;  %s889_s20 = sadd.s32 4294967294, %s1313_s18   ;;  %s1313_s18 = sphi %s1356_s18, %s1696_s18   ;;  %s1309_s17 = sphi %s1354_s17, %s1695_s17   ;;  %s1305_s16 = sphi %s1352_s16, %s1694_s16   ;;  %s1301_s15 = sphi %s1350_s15, %s1693_s15  }
   0xb   : > { %p43_p0 = scmp.ne.s32.totalorder %s1305_s16, %s1301_s15  ;;  %p1665_p1 = scmp.eq.s32.totalorder %s1371_s19, 0 }
   0xc   : > { %p141_p3 = scmp.eq.s32.totalorder %s889_s20, 1  ;;  %p890_p5 = scmp.ge.s32.totalorder %s1313_s18, 1 }
   0xd   : > { %p1380_p4 = por %p1665_p1, %p43_p0  ;;  %p148_p7 = scmp.lt.s32.totalorder %s1313_s18, 3 }
   0xe   : > { %p1385_p6 = por %p141_p3, %p43_p0  ;;  %s1315_s24 = smov [#allocation8]  }
   0xf   : > { %s1674_s21 = scalar_select %p1380_p4, 1, 0 }
  0x10   : > { %s1675_s22 = scalar_select %p1385_p6, 1, 0 }
  0x11   : > { %p1390_p8 = pnand %p890_p5, %p148_p7  ;;  %s160_s25 = sshll.u32 %s1315_s24, 4  ;;  %s1394_s25 = int_to_ptr.vmem [resolvable:$true] %s160_s25 }
  0x12   : > { %s1406_s27 = sadd.s32 1, %s1313_s18   ;;  %s30_s28 = sadd.s32 1, %s1309_s17 }
  0x13   : > { %s1676_s23 = scalar_select %p1390_p8, 1, 0 }
  0x14   : > { %p1067_p9 = pneg %p1390_p8  ;;  %s27_s29 = ssub.s32 %s1313_s18, %s1406_s27 }
  0x15   : > { %s1678_s2 = sld [smem:[#allocation16_spill]] }
  0x16   : > { %p1401_p11 = pnand %p1067_p9, %p1665_p1 }
  0x18   : > { %p1153_p13 = pneg %p1401_p11 }
  0x1b   : > { %s1151_s6 = scalar_lea.hbm %s1678_s2, 3072 }
  0x1c   : > { %p1152_p12 = scmp.ne.s32.totalorder %s1678_s2, %s1151_s6  ;;  %p1158_p5 = scmp.lt.u32.totalorder %s1151_s6, %s1678_s2 }
  0x1e   : > { %p1154_p0 = pnand %p1153_p13, %p1152_p12 }
  0x20   : > { %p1155_p3 = pneg %p1154_p0 }
  0x22   : > { %p1160_p7 = pnand %p1158_p5, %p1155_p3 }
  0x24   : > { %1163 = shalt.err (!%p1160_p7)
}
  0x25   : > { %s1164_s11 = scalar_lea.vmem %s1394_s25, 3072  ;;  %p1172_p2 = scmp.lt.s32.totalorder %s1394_s25, %s1394_s25 }
  0x26   : > { %p1165_p9 = scmp.ne.s32.totalorder %s1394_s25, %s1164_s11  ;;  %p1173_p6 = scmp.lt.s32.totalorder %s1164_s11, %s1164_s11 }
  0x28   : > { %p1167_p10 = pnand %p1165_p9, %p1153_p13  ;;  %p1174_p4 = por %p1173_p6, %p1172_p2 }
  0x2a   : > { %p1168_p1 = pneg %p1167_p10 }
  0x2c   : > { %p1175_p8 = pnand %p1174_p4, %p1168_p1 }
  0x2e   : > { %1178 = shalt.err (!%p1175_p8)
}
  0x2f   : > { %s1668_s12 = smov 64   ;;  %s1670_s13 = smov 4  }
  0x30   : > { %1070 = dma.hbm_to_vmem [thread:$0]  (!%p1401_p11), %s1678_s2, 3072, %s1394_s25, [#allocation7], %s1668_s12, %s1668_s12, %s1670_s13  }
  0x31   : > { %p28_p1 = scmp.eq.s32.totalorder %s27_s29, 0  ;;  %p37_p2 = scmp.ne.s32.totalorder %s1309_s17, %s1305_s16 }
  0x32   : > { %p38_p4 = scmp.eq.s32.totalorder %s1313_s18, 0  ;;  %p1083_p6 = scmp.lt.s32.totalorder %s1313_s18, 2 }
  0x33   : > { %s1440_s24 = scalar_select %p28_p1, %s1309_s17, %s30_s28  }
  0x34   : > { %p39_p8 = por %p38_p4, %p37_p2  ;;  %p1680_p10 = scmp.eq.s32.totalorder %s1371_s19, 1 }
  0x35   : > { %1679 = sst [smem:[#allocation14_spill]] %s1440_s24  ;;  %s177_s26 = sand.u32 1, %s1309_s17  }
  0x36   : > { %p1444_p12 = por %p1680_p10, %p37_p2  ;;  %s943_s5 = sshll.u32 %s1313_s18, 7 }
  0x37   : > { %s1450_s6 = sshll.u32 %s177_s26, 3  ;;  %s1682_s0 = sld [smem:[#allocation15_spill]] }
  0x38   : > { %s181_s28 = scalar_lea.vmem [#allocation3], %s1450_s6  ;;  %p1458_p11 = pnand %p1083_p6, %p39_p8 }
  0x39   : > { %s188_s29 = sshll.u32 %s181_s28, 4  ;;  %s1467_s14 = scalar_lea.hbm %s1661_s1, %s943_s5  ;;  %s1462_s29 = int_to_ptr.vmem [resolvable:$true] %s188_s29 }
  0x3a   : > { %s1469_s20 = scalar_lea.sflag [#allocation4], %s177_s26  ;;  %p1181_p0 = pneg %p1458_p11 }
  0x3d   : > { %s1455_s25 = scalar_lea.hbm %s1682_s0, %s943_s5  ;;  %s1184_s12 = scalar_lea.hbm %s1682_s0, 256 }
  0x3e   : > { %s1179_s7 = scalar_lea.hbm %s1455_s25, 128  ;;  %p1185_p7 = scmp.lt.u32.totalorder %s1455_s25, %s1682_s0 }
  0x3f   : > { %p1180_p13 = scmp.ne.s32.totalorder %s1455_s25, %s1179_s7  ;;  %p1186_p9 = scmp.lt.u32.totalorder %s1184_s12, %s1179_s7 }
  0x40   : > { %p1188_p2 = scmp.lt.u32.totalorder %s1179_s7, %s1455_s25 }
  0x41   : > { %p1182_p3 = pnand %p1181_p0, %p1180_p13  ;;  %p1187_p1 = por %p1186_p9, %p1185_p7 }
  0x43   : > { %p1183_p5 = pneg %p1182_p3  ;;  %p1189_p4 = por %p1188_p2, %p1187_p1 }
  0x45   : > { %p1190_p6 = pnand %p1189_p4, %p1183_p5 }
  0x47   : > { %1193 = shalt.err (!%p1190_p6)
}
  0x48   : > { %s1194_s26 = scalar_lea.vmem %s1462_s29, 128  ;;  %s1318_s5 = smov [#allocation3]  }
  0x49   : > { %p1195_p8 = scmp.ne.s32.totalorder %s1462_s29, %s1194_s26  ;;  %s1199_s10 = sshll.u32 %s1318_s5, 4  ;;  %s1200_s10 = int_to_ptr.vmem [resolvable:$false] %s1199_s10 }
  0x4a   : > { %s1201_s2 = scalar_lea.vmem %s1200_s10, 256  ;;  %p1202_p3 = scmp.lt.s32.totalorder %s1462_s29, %s1200_s10 }
  0x4b   : > { %p1197_p10 = pnand %p1195_p8, %p1181_p0  ;;  %p1203_p7 = scmp.lt.s32.totalorder %s1201_s2, %s1194_s26 }
  0x4d   : > { %p1198_p13 = pneg %p1197_p10  ;;  %p1204_p9 = por %p1203_p7, %p1202_p3 }
  0x4f   : > { %p1205_p1 = pnand %p1204_p9, %p1198_p13 }
  0x51   : > { %1208 = shalt.err (!%p1205_p1)
}
  0x52   : > { %s1684_s12 = smov 4   ;;  %s1685_s13 = smov 64  }
  0x53   : > { %1074 = dma.hbm_to_vmem [thread:$0]  (!%p1458_p11), %s1455_s25, 128, %s1462_s29, %s1469_s20, %s1685_s13, %s1685_s13, %s1684_s12  }
  0x54   : > { %s202_s11 = scalar_lea.vmem [#allocation6], %s1450_s6  ;;  %s198_s8 = sand.u32 1, %s1313_s18  }
  0x55   : > { %s209_s7 = sshll.u32 %s202_s11, 4  ;;  %s1504_s28 = scalar_lea.sflag [#allocation7], %s198_s8  ;;  %s1502_s7 = int_to_ptr.vmem [resolvable:$true] %s209_s7 }
  0x56   : > { %s1209_s26 = scalar_lea.hbm %s1467_s14, 128  ;;  %s1214_s2 = scalar_lea.hbm %s1661_s1, 256 }
  0x57   : > { %p1210_p5 = scmp.ne.s32.totalorder %s1467_s14, %s1209_s26  ;;  %p1215_p6 = scmp.lt.u32.totalorder %s1467_s14, %s1661_s1 }
  0x58   : > { %p1216_p8 = scmp.lt.u32.totalorder %s1214_s2, %s1209_s26  ;;  %p1218_p13 = scmp.lt.u32.totalorder %s1209_s26, %s1467_s14 }
  0x59   : > { %p1212_p2 = pnand %p1210_p5, %p1181_p0 }
  0x5a   : > { %p1217_p10 = por %p1216_p8, %p1215_p6 }
  0x5b   : > { %p1213_p4 = pneg %p1212_p2 }
  0x5c   : > { %p1219_p3 = por %p1218_p13, %p1217_p10 }
  0x5e   : > { %p1220_p7 = pnand %p1219_p3, %p1213_p4 }
  0x60   : > { %1223 = shalt.err (!%p1220_p7)
}
  0x61   : > { %s1224_s6 = scalar_lea.vmem %s1502_s7, 128  ;;  %s1319_s25 = smov [#allocation6]  }
  0x62   : > { %p1225_p9 = scmp.ne.s32.totalorder %s1502_s7, %s1224_s6  ;;  %s1229_s29 = sshll.u32 %s1319_s25, 4  ;;  %s1230_s29 = int_to_ptr.vmem [resolvable:$false] %s1229_s29 }
  0x63   : > { %s1231_s0 = scalar_lea.vmem %s1230_s29, 256  ;;  %p1232_p2 = scmp.lt.s32.totalorder %s1502_s7, %s1230_s29 }
  0x64   : > { %p1227_p1 = pnand %p1225_p9, %p1181_p0  ;;  %p1233_p6 = scmp.lt.s32.totalorder %s1231_s0, %s1224_s6 }
  0x66   : > { %p1228_p5 = pneg %p1227_p1  ;;  %p1234_p8 = por %p1233_p6, %p1232_p2 }
  0x68   : > { %p1235_p10 = pnand %p1234_p8, %p1228_p5 }
  0x6a   : > { %1238 = shalt.err (!%p1235_p10)
}
  0x6b   : > { %1077 = dma.hbm_to_vmem [thread:$0]  (!%p1458_p11), %s1467_s14, 128, %s1502_s7, %s1504_s28, %s1685_s13, %s1685_s13, %s1684_s12  }
  0x6c   : > { %p1686_p0 = scmp.ne.s32.totalorder %s1676_s23, 0 }
  0x6d   : > { %s1536_s24 = sand.u32 (!%p1686_p0), 1, %s1305_s16   ;;  %p1687_p4 = scmp.ne.s32.totalorder (!%p1686_p0), %s1674_s21, 0 }
  0x6e   : > { %221 = sbr.rel (%p1686_p0) target bundleno = 1455 (0x5af), region = 36  ;;  %s900_s20 = sshll.u32 (!%p1686_p0), %s1536_s24, 3 }
  0x6f   : > { %s224_s11 = scalar_lea.sflag (!%p1686_p0), [#allocation4], %s1536_s24  ;;  %s227_s8 = scalar_lea.vmem (!%p1686_p0), [#allocation3], %s900_s20 }
  0x75   : > { %1284 = dma.done.wait (%p1687_p4), %s224_s11, 128  }
  0x76   : > { %1286 = vsyncadd (%p1687_p4), %s224_s11, 4294967168  ;;  %s232_s9 = sand.u32 1, %s1371_s19   ;;  %s236_s23 = scalar_lea.vmem [#allocation6], %s900_s20 }
  0x77   : > { %s233_s14 = scalar_lea.sflag [#allocation7], %s232_s9 }
  0x78   : > { %1288 = dma.done.wait (%p1687_p4), %s233_s14, 128  }
  0x79   : > { %1290 = vsyncadd (%p1687_p4), %s233_s14, 4294967168  ;;  %p1688_p11 = scmp.eq.s32.totalorder %s1371_s19, 0 }
  0x7b   : > { %1292 = dma.done.wait (%p1688_p11), [#allocation7], 3072   ;;  %p1689_p13 = pmov %p1688_p11 }
  0x7c   : > { %v1320_v0 = vmov 0.0   ;;  %vm1321_vm0 = vmmov 0   ;;  %v1125_v1 = vld [vmem:[%s236_s23] sm:$0xff]   ;;  %v1559_v2 = vld [vmem:[%s227_s8] sm:$0xff]   ;;  %vm288_vm1 = vcmask 130048   ;;  %s903_s28 = sshll.u32 %s1536_s24, 4 }
  0x7d   : > { %1294 = vsyncadd (%p1689_p13), [#allocation7], 4294964224  ;;  %979 = vmatprep.subr.bf16.mxu0 %v1320_v0  ;;  %981 = vmatprep.mubr.msk.bf16.mxu0 %vm1321_vm0, %v1320_v0  ;;  %v1127_v3 = vld [vmem:[#allocation8] sm:$0xff]   ;;  %v1128_v4 = vld [vmem:[#allocation8 + $0x8] sm:$0xff]   ;;  %s269_s10 = scalar_lea.vmem [#allocation9], %s903_s28  ;;  %s945_s6 = sshll.u32 %s1371_s19, 8 }
  0x7e   : > { %985 = vmatprep.subr.bf16.mxu1 %v1320_v0  ;;  %1001 = vmatprep.mubr.msk.bf16.mxu1 %vm1321_vm0, %v1320_v0  ;;  %v1129_v5 = vld [vmem:[#allocation8 + $0x10] sm:$0xff]   ;;  %v1130_v6 = vld [vmem:[#allocation8 + $0x18] sm:$0xff]   ;;  %v1131_v7 = vld [vmem:[#allocation8 + $0x20] sm:$0xff]   ;;  %s784_s2 = sshll.u32 %s269_s10, 4  ;;  %s1616_s0 = scalar_lea.hbm %s1664_s4, %s945_s6  ;;  %s1611_s2 = int_to_ptr.vmem [resolvable:$true] %s784_s2 }
  0x7f   : > { %980 = vmatpush3.bf16.msra.mxu0 %v1125_v1  ;;  %986 = vmatpush3.bf16.msra.mxu1 %v1127_v3  ;;  %v1132_v8 = vld [vmem:[#allocation8 + $0x28] sm:$0xff]   ;;  %v1133_v9 = vld [vmem:[#allocation8 + $0x30] sm:$0xff]   ;;  %v1134_v10 = vld [vmem:[#allocation8 + $0x38] sm:$0xff]   ;;  %s771_s20 = scalar_lea.sflag [#allocation5], %s1536_s24  ;;  %s1239_s19 = scalar_lea.vmem %s1611_s2, 256 }
  0x80   : > { %1005 = vmatprep.subr.bf16.mxu0 %v1320_v0  ;;  %987 = vmatprep.subr.bf16.mxu1 %v1320_v0  ;;  %v907_v16 = vld [vmem:[%s1663_s3] ss:$0 sm:$0xff]  ;;  %v1136_v27 = vld [vmem:[#allocation8 + $0x48] sm:$0xff]   ;;  %v1137_v28 = vld [vmem:[#allocation8 + $0x50] sm:$0xff]   ;;  %p1240_p3 = scmp.ne.s32.totalorder %s1611_s2, %s1239_s19  ;;  %s1322_s11 = smov [#allocation9]  }
  0x81   : > { %v1135_v26 = vld [vmem:[#allocation8 + $0x40] sm:$0xff]   ;;  %v1138_v29 = vld [vmem:[#allocation8 + $0x58] sm:$0xff]   ;;  %v1140_v31 = vld [vmem:[#allocation8 + $0x68] sm:$0xff]   ;;  %s1243_s8 = sshll.u32 %s1322_s11, 4  ;;  %s1244_s8 = int_to_ptr.vmem [resolvable:$false] %s1243_s8 }
  0x82   : > { %982 = vmatmul.mubr.msk.bf16.vlgmr.msra.gmra.mrb[0].mxu0 %vm288_vm1, %v1559_v2  ;;  %v1139_v30 = vld [vmem:[#allocation8 + $0x60] sm:$0xff]   ;;  %v1141_v32 = vld [vmem:[#allocation8 + $0x70] sm:$0xff]   ;;  %v1142_v33 = vld [vmem:[#allocation8 + $0x78] sm:$0xff]   ;;  %p1241_p7 = pnand %p1240_p3, %p1444_p12  ;;  %s1245_s9 = scalar_lea.vmem %s1244_s8, 512 }
  0x83   : > { %1007 = vmatprep.mubr.msk.bf16.mxu0 %vm1321_vm0, %v1320_v0  ;;  %988 = vmatpush3.bf16.msra.mxu1 %v1128_v4  ;;  %v1143_v39 = vld [vmem:[#allocation8 + $0x80] sm:$0xff]   ;;  %v1144_v40 = vld [vmem:[#allocation8 + $0x88] sm:$0xff]   ;;  %v1145_v41 = vld [vmem:[#allocation8 + $0x90] sm:$0xff]   ;;  %p1246_p1 = scmp.lt.s32.totalorder %s1611_s2, %s1244_s8  ;;  %p1247_p5 = scmp.lt.s32.totalorder %s1245_s9, %s1239_s19 }
  0x84   : > { %989 = vmatprep.subr.bf16.mxu1 %v1320_v0  ;;  %v1146_v42 = vld [vmem:[#allocation8 + $0x98] sm:$0xff]   ;;  %v1147_v43 = vld [vmem:[#allocation8 + $0xa0] sm:$0xff]   ;;  %v1148_v44 = vld [vmem:[#allocation8 + $0xa8] sm:$0xff]   ;;  %p1242_p9 = pneg %p1241_p7 }
  0x85   : > { %v1149_v45 = vld [vmem:[#allocation8 + $0xb0] sm:$0xff]   ;;  %v918_v46 = vld [vmem:[%s1663_s3 + $0x1] ss:$0 sm:$0xff]  ;;  %v1150_v56 = vld [vmem:[#allocation8 + $0xb8] sm:$0xff]   ;;  %p1248_p2 = por %p1247_p5, %p1246_p1 }
  0x86   : > { %v929_v62 = vld [vmem:[%s1663_s3 + $0x2] ss:$0 sm:$0xff] }
  0x87   : > { %990 = vmatpush3.bf16.msra.mxu1 %v1129_v5  ;;  %p1249_p6 = pnand %p1248_p2, %p1242_p9 }
  0x88   : > { %991 = vmatprep.subr.bf16.mxu1 %v1320_v0 }
  0x8b   : > { %992 = vmatpush3.bf16.msra.mxu1 %v1130_v6 }
  0x8c   : > { %993 = vmatprep.subr.bf16.mxu1 %v1320_v0 }
  0x8f   : > { %994 = vmatpush3.bf16.msra.mxu1 %v1131_v7 }
  0x90   : > { %995 = vmatprep.subr.bf16.mxu1 %v1320_v0 }
  0x93   : > { %996 = vmatpush3.bf16.msra.mxu1 %v1132_v8 }
  0x94   : > { %997 = vmatprep.subr.bf16.mxu1 %v1320_v0 }
  0x97   : > { %998 = vmatpush3.bf16.msra.mxu1 %v1133_v9 }
  0x98   : > { %999 = vmatprep.subr.bf16.mxu1 %v1320_v0 }
  0x9b   : > { %1000 = vmatpush3.bf16.msra.mxu1 %v1134_v10 }
  0x9c   : > { %1037 = vmatprep.subr.bf16.mxu1 %v1320_v0 }
 0x155   : > { %v326_v11 = vpop.f32.mrb[0].mxu0 }
 0x156   : > { %v983_v12 = vpop.f32.mrb[1].mxu0 }
 0x157   : > { %v329_v13 = vpop.f32.mrb[2].mxu0 }
 0x158   : > { %v333_v14 = vpack.c.bf16 %v329_v13, %v326_v11  ;;  %v984_v15 = vpop.f32.mrb[3].mxu0 }
 0x15a   : > { %1002 = vmatmul.mubr.bf16.vlgmr.msra.gmra.mrb[0].mxu1 %v333_v14 }
 0x15b   : > { %1053 = vmatprep.mubr.msk.bf16.mxu1 %vm1321_vm0, %v1320_v0  ;;  %1038 = vmatpush3.bf16.msra.mxu1 %v1143_v39 }
 0x15c   : > { %1039 = vmatprep.subr.bf16.mxu1 %v1320_v0 }
 0x15f   : > { %1040 = vmatpush3.bf16.msra.mxu1 %v1144_v40 }
 0x160   : > { %1041 = vmatprep.subr.bf16.mxu1 %v1320_v0 }
 0x163   : > { %1042 = vmatpush3.bf16.msra.mxu1 %v1145_v41 }
 0x164   : > { %1043 = vmatprep.subr.bf16.mxu1 %v1320_v0 }
 0x167   : > { %1044 = vmatpush3.bf16.msra.mxu1 %v1146_v42 }
 0x168   : > { %1045 = vmatprep.subr.bf16.mxu1 %v1320_v0 }
 0x16b   : > { %1046 = vmatpush3.bf16.msra.mxu1 %v1147_v43 }
 0x16c   : > { %1047 = vmatprep.subr.bf16.mxu1 %v1320_v0 }
 0x16f   : > { %1048 = vmatpush3.bf16.msra.mxu1 %v1148_v44 }
 0x170   : > { %1049 = vmatprep.subr.bf16.mxu1 %v1320_v0 }
 0x173   : > { %1050 = vmatpush3.bf16.msra.mxu1 %v1149_v45 }
 0x174   : > { %1051 = vmatprep.subr.bf16.mxu1 %v1320_v0 }
 0x177   : > { %1052 = vmatpush3.bf16.msra.mxu1 %v1150_v56 }
 0x22d   : > { %v439_v17 = vpop.f32.mrb[0].mxu1 }
 0x22e   : > { %v440_v18 = vadd.f32 %v907_v16, %v439_v17  ;;  %v1003_v19 = vpop.f32.mrb[1].mxu1 }
 0x22f   : > { %v442_v20 = vpop.f32.mrb[2].mxu1 }
 0x230   : > { %v443_v21 = vadd.f32 %v907_v16, %v442_v20  ;;  %v1004_v22 = vpop.f32.mrb[3].mxu1  ;;  %v446_v23 = vmax.f32 %v440_v18, 0.0 }
 0x232   : > { %v447_v24 = vmax.f32 %v443_v21, 0.0 }
 0x234   : > { %v448_v25 = vpack.c.bf16 %v447_v24, %v446_v23 }
 0x236   : > { %1006 = vmatpush3.bf16.msra.mxu0 %v448_v25 }
 0x237   : > { %1011 = vmatprep.subr.bf16.mxu0 %v1320_v0 }
 0x239   : > { %1008 = vmatmul.mubr.msk.bf16.vlgmr.msra.gmra.mrb[4].mxu0 %vm288_vm1, %v1559_v2 }
 0x23a   : > { %1012 = vmatpush3.bf16.msra.mxu0 %v1135_v26  ;;  %1027 = vmatprep.mubr.msk.bf16.mxu0 %vm1321_vm0, %v1320_v0 }
 0x23b   : > { %1013 = vmatprep.subr.bf16.mxu0 %v1320_v0 }
 0x23e   : > { %1014 = vmatpush3.bf16.msra.mxu0 %v1136_v27 }
 0x23f   : > { %1015 = vmatprep.subr.bf16.mxu0 %v1320_v0 }
 0x242   : > { %1016 = vmatpush3.bf16.msra.mxu0 %v1137_v28 }
 0x243   : > { %1017 = vmatprep.subr.bf16.mxu0 %v1320_v0 }
 0x246   : > { %1018 = vmatpush3.bf16.msra.mxu0 %v1138_v29 }
 0x247   : > { %1019 = vmatprep.subr.bf16.mxu0 %v1320_v0 }
 0x24a   : > { %1020 = vmatpush3.bf16.msra.mxu0 %v1139_v30 }
 0x24b   : > { %1021 = vmatprep.subr.bf16.mxu0 %v1320_v0 }
 0x24e   : > { %1022 = vmatpush3.bf16.msra.mxu0 %v1140_v31 }
 0x24f   : > { %1023 = vmatprep.subr.bf16.mxu0 %v1320_v0 }
 0x252   : > { %1024 = vmatpush3.bf16.msra.mxu0 %v1141_v32 }
 0x253   : > { %1025 = vmatprep.subr.bf16.mxu0 %v1320_v0 }
 0x256   : > { %1026 = vmatpush3.bf16.msra.mxu0 %v1142_v33 }
 0x257   : > { %1031 = vmatprep.subr.bf16.mxu0 %v1320_v0 }
 0x30c   : > { %v485_v34 = vpop.f32.mrb[4].mxu0 }
 0x30d   : > { %v1009_v35 = vpop.f32.mrb[5].mxu0 }
 0x30e   : > { %v488_v36 = vpop.f32.mrb[6].mxu0 }
 0x30f   : > { %v492_v37 = vpack.c.bf16 %v488_v36, %v485_v34  ;;  %v1010_v38 = vpop.f32.mrb[7].mxu0 }
 0x311   : > { %1028 = vmatmul.mubr.bf16.vlgmr.msra.gmra.mrb[8].mxu0 %v492_v37 }
 0x312   : > { %1033 = vmatprep.mubr.msk.bf16.mxu0 %vm1321_vm0, %v1320_v0 }
 0x3e4   : > { %v600_v47 = vpop.f32.mrb[8].mxu0 }
 0x3e5   : > { %v601_v48 = vadd.f32 %v918_v46, %v600_v47  ;;  %v1029_v49 = vpop.f32.mrb[9].mxu0 }
 0x3e6   : > { %v603_v50 = vpop.f32.mrb[10].mxu0 }
 0x3e7   : > { %v604_v51 = vadd.f32 %v918_v46, %v603_v50  ;;  %v1030_v52 = vpop.f32.mrb[11].mxu0  ;;  %v607_v53 = vmax.f32 %v601_v48, 0.0 }
 0x3e9   : > { %v608_v54 = vmax.f32 %v604_v51, 0.0 }
 0x3eb   : > { %v609_v55 = vpack.c.bf16 %v608_v54, %v607_v53 }
 0x3ed   : > { %1032 = vmatpush3.bf16.msra.mxu0 %v609_v55 }
 0x3f0   : > { %1034 = vmatmul.mubr.msk.bf16.vlgmr.msra.gmra.mrb[12].mxu0 %vm288_vm1, %v1559_v2 }
 0x4c3   : > { %v646_v57 = vpop.f32.mrb[12].mxu0 }
 0x4c4   : > { %v1035_v58 = vpop.f32.mrb[13].mxu0 }
 0x4c5   : > { %v649_v59 = vpop.f32.mrb[14].mxu0 }
 0x4c6   : > { %v653_v60 = vpack.c.bf16 %v649_v59, %v646_v57  ;;  %v1036_v61 = vpop.f32.mrb[15].mxu0 }
 0x4c8   : > { %1054 = vmatmul.mubr.bf16.vlgmr.msra.gmra.mrb[4].mxu1 %v653_v60 }
 0x59b   : > { %v761_v63 = vpop.f32.mrb[4].mxu1 }
 0x59c   : > { %v762_v0 = vadd.f32 %v929_v62, %v761_v63  ;;  %v1055_v1 = vpop.f32.mrb[5].mxu1 }
 0x59d   : > { %v764_v2 = vpop.f32.mrb[6].mxu1 }
 0x59e   : > { %768 = vst [vmem:[%s269_s10] sm:$0xff] %v762_v0  ;;  %v765_v3 = vadd.f32 %v929_v62, %v764_v2  ;;  %v1056_v4 = vpop.f32.mrb[7].mxu1 }
 0x5a0   : > { %769 = vst [vmem:[%s269_s10 + $0x8] sm:$0xff] %v765_v3 }
 0x5a1   : > { %1252 = shalt.err (!%p1249_p6)
}
 0x5a2   : > { %s1253_s14 = scalar_lea.hbm %s1616_s0, 256  ;;  %s1257_s12 = scalar_lea.hbm %s1664_s4, 512 }
 0x5a3   : > { %p1254_p8 = scmp.ne.s32.totalorder %s1616_s0, %s1253_s14  ;;  %p1258_p4 = scmp.lt.u32.totalorder %s1616_s0, %s1664_s4 }
 0x5a4   : > { %p1259_p11 = scmp.lt.u32.totalorder %s1257_s12, %s1253_s14  ;;  %p1261_p3 = scmp.lt.u32.totalorder %s1253_s14, %s1616_s0 }
 0x5a5   : > { %p1255_p10 = pnand %p1254_p8, %p1444_p12 }
 0x5a6   : > { %p1260_p13 = por %p1259_p11, %p1258_p4 }
 0x5a7   : > { %p1256_p0 = pneg %p1255_p10 }
 0x5a8   : > { %p1262_p7 = por %p1261_p3, %p1260_p13 }
 0x5aa   : > { %p1263_p9 = pnand %p1262_p7, %p1256_p0 }
 0x5ac   : > { %1266 = shalt.err (!%p1263_p9)
}
 0x5ad   : > { %s1323_s28 = smov 128   ;;  %s1324_s26 = smov 8  }
 0x5ae   : > { %1065 = dma.vmem_to_hbm [thread:$0]  (%p1444_p12), %s1611_s2, 256, %s1616_s0, %s771_s20, %s1323_s28, %s1323_s28, %s1324_s26  }
 0x5af PF: > { %s799_s5 = sand.u32 1, %s1301_s15   ;;  %p1690_p1 = scmp.ne.s32.totalorder %s1675_s22, 0 }
 0x5b0   : > { %p1691_p5 = scmp.ge.s32.totalorder %s1313_s18, 2  ;;  %s800_s10 = scalar_lea.sflag [#allocation5], %s799_s5 }
 0x5b2   : > { %p1079_p2 = pnand %p1691_p5, %p1690_p1 }
 0x5b4   : > { %1296 = dma.done.wait (!%p1079_p2), %s800_s10, 256  }
 0x5b5   : > { %1298 = vsyncadd (!%p1079_p2), %s800_s10, 4294967040  ;;  %s1692_s6 = sld [smem:[#allocation14_spill]]  ;;  %p20_p6 = scmp.ge.s32.totalorder %s1406_s27, 4  }
 0x5b6   : > { %s1693_s15 = smov %s1305_s16  ;;  %s1694_s16 = smov %s1309_s17 }
 0x5b7   : > { %s1696_s18 = smov %s1406_s27  ;;  %22 = sbr.rel (!%p20_p6) target bundleno = 10 (0xa), region = 102 }
 0x5bb   : > { %s1695_s17 = smov %s1692_s6 }
 0x5be   :  { %805 = vsyncpa [#allocation4], 1 }
 0x5bf   :  { %807 = vsyncpa [#allocation4 + $0x1], 1 }
 0x5c0   :  { %808 = vsyncpa [#allocation7], 1 }
 0x5c1   :  { %810 = vsyncpa [#allocation7 + $0x1], 1 }
 0x5c2   :  { %811 = vsyncpa [#allocation5], 1 }
 0x5c3   :  { %813 = vsyncpa [#allocation5 + $0x1], 1 }

</bundles_post_ra>
